<compile_context>
chip_gen: v7x
topology: tpu7x:2x2x1
jax: 0.10.0
libtpu: 0.0.40
codegen_flags: <defaults>
</compile_context>

<pallas_src>
import jax
import jax.numpy as jnp
from jax.experimental import pallas as pl
from jax.experimental.pallas import tpu as pltpu


def _round_up(x, m):
    return ((x + m - 1) // m) * m


def _pick_tile_m(M):
    """M tile: <=512, multiple of 8, and >=2 blocks when M allows (v7x megacore)."""
    Mr = _round_up(M, 8)
    tm = min(512, Mr)
    if Mr // tm < 2 and Mr >= 16:
        tm = _round_up(Mr // 2, 8)
    return tm


def _pick_tile_n(Np):
    """Np is a multiple of 128; pick a lane-dense tile that divides it."""
    if Np <= 512:
        return Np
    for tn in (512, 256, 128):
        if Np % tn == 0:
            return tn
    return 128


def _pick_tk(Kp):
    """Kp is a multiple of 128; pick tk dividing Kp exactly (no dead K tiles)."""
    if Kp <= 1024:
        return Kp
    for tk in (512, 384, 256, 128):
        if Kp % tk == 0:
            return tk
    return 128


# ----------------------------------------------------------------------------
# Pallas kernels
# ----------------------------------------------------------------------------

def _make_gemm_kernel(relu, has_res, single_k):
    """(tm,tk)x(tk,tn) MXU matmul with fused bias [+residual] [+ReLU] epilogue.

    single_k: only one K tile -> no VMEM accumulator scratch, no init/finalize,
    result is written straight to o_ref (saves a zero-init store and a full
    tm*tn f32 scratch read-modify-write per block)."""
    def kernel(*refs):
        a_ref, b_ref, c_ref = refs[0], refs[1], refs[2]
        idx = 3
        r_ref = None
        if has_res:
            r_ref = refs[idx]
            idx += 1
        o_ref = refs[idx]
        idx += 1
        acc_ref = None if single_k else refs[idx]

        def epilogue(acc):
            acc = acc + c_ref[...]                       # folded BN / conv bias (f32)
            if has_res:
                acc = acc + r_ref[...].astype(jnp.float32)   # residual BEFORE relu
            if relu:
                acc = jnp.maximum(acc, 0.0)
            o_ref[...] = acc.astype(o_ref.dtype)

        if single_k:
            epilogue(jnp.dot(a_ref[...], b_ref[...],
                             preferred_element_type=jnp.float32))
        else:
            k = pl.program_id(2)

            @pl.when(k == 0)
            def _():
                acc_ref[...] = jnp.zeros_like(acc_ref)

            acc_ref[...] += jnp.dot(a_ref[...], b_ref[...],
                                    preferred_element_type=jnp.float32)

            @pl.when(k == pl.num_programs(2) - 1)
            def _():
                epilogue(acc_ref[...])
    return kernel


def gemm_bias_act(x2d, w2d, bias, *, relu=False, residual=None):
    """out = act((x2d @ w2d) + bias [+ residual]).  bf16 in/out, f32 accumulate."""
    M, K = x2d.shape
    Kw, N = w2d.shape
    assert K == Kw

    Kp = _round_up(K, 128)
    tk = _pick_tk(Kp)
    Np = _round_up(N, 128)
    tn = _pick_tile_n(Np)
    tm = _pick_tile_m(M)
    Mp = _round_up(M, tm)

    # cast BEFORE pad (halves the bytes moved by the XLA pad copies).
    a = jnp.pad(x2d.astype(jnp.bfloat16), ((0, Mp - M), (0, Kp - K)))
    b = jnp.pad(w2d.astype(jnp.bfloat16), ((0, Kp - K), (0, Np - N)))
    c = jnp.pad(bias.astype(jnp.float32).reshape(1, N), ((0, 0), (0, Np - N)))

    has_res = residual is not None
    single_k = (Kp // tk) == 1

    args = [a, b, c]
    if single_k:
        in_specs = [pl.BlockSpec((tm, tk), lambda i, j: (i, 0)),
                    pl.BlockSpec((tk, tn), lambda i, j: (0, j)),
                    pl.BlockSpec((1, tn), lambda i, j: (0, j))]
        out_spec = pl.BlockSpec((tm, tn), lambda i, j: (i, j))
        grid = (Mp // tm, Np // tn)
        scratch = []
        dims = ("parallel", "parallel")
        res_spec = pl.BlockSpec((tm, tn), lambda i, j: (i, j))
    else:
        in_specs = [pl.BlockSpec((tm, tk), lambda i, j, k: (i, k)),
                    pl.BlockSpec((tk, tn), lambda i, j, k: (k, j)),
                    pl.BlockSpec((1, tn), lambda i, j, k: (0, j))]
        out_spec = pl.BlockSpec((tm, tn), lambda i, j, k: (i, j))
        grid = (Mp // tm, Np // tn, Kp // tk)
        scratch = [pltpu.VMEM((tm, tn), jnp.float32)]
        dims = ("parallel", "parallel", "arbitrary")
        res_spec = pl.BlockSpec((tm, tn), lambda i, j, k: (i, j))

    if has_res:
        r = jnp.pad(residual.astype(jnp.bfloat16), ((0, Mp - M), (0, Np - N)))
        args.append(r)
        in_specs.append(res_spec)

    out = pl.pallas_call(
        _make_gemm_kernel(relu, has_res, single_k),
        out_shape=jax.ShapeDtypeStruct((Mp, Np), jnp.bfloat16),
        grid=grid,
        in_specs=in_specs,
        out_specs=out_spec,
        scratch_shapes=scratch,
        compiler_params=pltpu.CompilerParams(dimension_semantics=dims),
    )(*args)
    return out[:M, :N]


def _make_conv3_kernel(Ho, Wp, relu):
    """Direct 3x3 stride-1 conv on one padded image, tap-unrolled shift trick.

    x_ref:  (1, Hp*Wp + Wp, Cin)   flattened padded image (+1 guard row of zeros)
    w_ref:  (9, Cin, tn)           per-tap weight matrices (BN scale folded)
    b_ref:  (1, tn)                folded bias (f32)
    o_ref:  (1, Ho*Wp, tn)         output over the padded width (garbage cols sliced
                                   off by the wrapper)."""
    Mg = Ho * Wp

    def kernel(x_ref, w_ref, b_ref, o_ref):
        acc = jnp.zeros((Mg, o_ref.shape[-1]), jnp.float32)
        for ki in range(3):
            for kj in range(3):
                off = ki * Wp + kj
                a = x_ref[0, off:off + Mg, :]              # contiguous sublane slice
                acc = acc + jnp.dot(a, w_ref[ki * 3 + kj],
                                    preferred_element_type=jnp.float32)
        acc = acc + b_ref[...]
        if relu:
            acc = jnp.maximum(acc, 0.0)
        o_ref[0] = acc.astype(o_ref.dtype)
    return kernel


def conv3x3_s1(x, conv, bn, *, relu=False):
    """3x3 / stride 1 / pad 1 conv + folded BN [+ReLU], no im2col materialization."""
    N, H, W, Cin = x.shape
    Cout = conv['w'].shape[0]
    scale, bias = fold_bn(bn, conv['b'], Cout)

    # Per-tap weight matrices (Cin, Cout) with the BN scale folded in.
    w = jnp.transpose(conv['w'], (2, 3, 1, 0)).reshape(9, Cin, Cout) * scale[None, None, :]

    Hp, Wp = H + 2, W + 2
    Np = _round_up(Cout, 128)
    tn = _pick_tile_n(Np)
    wb = jnp.pad(w.astype(jnp.bfloat16), ((0, 0), (0, 0), (0, Np - Cout)))
    bb = jnp.pad(bias.astype(jnp.float32).reshape(1, Cout), ((0, 0), (0, Np - Cout)))

    # Pad spatially, flatten (H,W) and add one guard row so tap slices never run OOB.
    xp = jnp.pad(x.astype(jnp.bfloat16), ((0, 0), (1, 1), (1, 1), (0, 0)))
    xf = jnp.pad(xp.reshape(N, Hp * Wp, Cin), ((0, 0), (0, Wp), (0, 0)))
    Lf = Hp * Wp + Wp
    Mg = H * Wp                                           # outputs over padded width

    # TODO(synk): for very large images, tile rows (with a 2-row halo) instead of
    # pulling the whole padded image into VMEM per grid step.
    out = pl.pallas_call(
        _make_conv3_kernel(H, Wp, relu),
        out_shape=jax.ShapeDtypeStruct((N, Mg, Np), jnp.bfloat16),
        grid=(N, Np // tn),
        in_specs=[pl.BlockSpec((1, Lf, Cin), lambda n, j: (n, 0, 0)),
                  pl.BlockSpec((9, Cin, tn), lambda n, j: (0, 0, j)),
                  pl.BlockSpec((1, tn), lambda n, j: (0, j))],
        out_specs=pl.BlockSpec((1, Mg, tn), lambda n, j: (n, 0, j)),
        compiler_params=pltpu.CompilerParams(
            dimension_semantics=("parallel", "parallel")),
    )(xf, wb, bb)
    return out.reshape(N, H, Wp, Np)[:, :, :W, :Cout]


def _maxpool_kernel(p_ref, o_ref):
    o_ref[...] = jnp.max(p_ref[...], axis=1)


def maxpool_reduce(patches, tile_m=1024):
    """patches: (M, KK, C) bf16 -> max over KK -> (M, C), tiled over M."""
    M, KK, C = patches.shape
    tm = min(tile_m, _round_up(M, 8))
    Mp = _round_up(M, tm)
    p = jnp.pad(patches, ((0, Mp - M), (0, 0), (0, 0)))
    out = pl.pallas_call(
        _maxpool_kernel,
        out_shape=jax.ShapeDtypeStruct((Mp, C), patches.dtype),
        grid=(Mp // tm,),
        in_specs=[pl.BlockSpec((tm, KK, C), lambda i: (i, 0, 0))],
        out_specs=pl.BlockSpec((tm, C), lambda i: (i, 0)),
        compiler_params=pltpu.CompilerParams(dimension_semantics=("parallel",)),
    )(p)
    return out[:M]


def _make_involution_kernel(relu, gc):
    """Tap-weighted sum with per-group weights broadcast to full channels in-kernel."""
    def kernel(p_ref, w_ref, o_ref):
        p = p_ref[...].astype(jnp.float32)          # (tm, 9, C)
        w = w_ref[...].astype(jnp.float32)          # (tm, 9, G)
        tm, KK, C = p.shape
        G = w.shape[-1]
        if G == 1:
            out = jnp.sum(p * w, axis=1)            # broadcast weight over all lanes
        else:
            out = jnp.sum(p.reshape(tm, KK, G, gc) * w[..., None], axis=1)
            out = out.reshape(tm, C)
        if relu:
            out = jnp.maximum(out, 0.0)
        o_ref[...] = out.astype(o_ref.dtype)
    return kernel


def involution_agg(patches, weights, gc, *, relu=False, tile_m=1024):
    """patches: (M, 9, C) bf16, weights: (M, 9, G) compact per-group -> (M, C)."""
    M, KK, C = patches.shape
    G = weights.shape[-1]
    tm = min(tile_m, _round_up(M, 8))
    Mp = _round_up(M, tm)
    p = jnp.pad(patches.astype(jnp.bfloat16), ((0, Mp - M), (0, 0), (0, 0)))
    w = jnp.pad(weights.astype(jnp.bfloat16), ((0, Mp - M), (0, 0), (0, 0)))
    # TODO(synk): for the stem C=16 this uses 16/128 lanes; pack 8 spatial rows into
    # the lane dim for a fully lane-dense layout if this op ever dominates.
    out = pl.pallas_call(
        _make_involution_kernel(relu, gc),
        out_shape=jax.ShapeDtypeStruct((Mp, C), jnp.bfloat16),
        grid=(Mp // tm,),
        in_specs=[pl.BlockSpec((tm, KK, C), lambda i: (i, 0, 0)),
                  pl.BlockSpec((tm, KK, G), lambda i: (i, 0, 0))],
        out_specs=pl.BlockSpec((tm, C), lambda i: (i, 0)),
        compiler_params=pltpu.CompilerParams(dimension_semantics=("parallel",)),
    )(p, w)
    return out[:M]


# ----------------------------------------------------------------------------
# Plain-JAX glue (patch extraction for the few remaining users, BN folding, wiring)
# ----------------------------------------------------------------------------

_BN_EPS = 1e-5


def extract_patches(x, k, stride, pad, pad_value=0.0):
    """x: (N,H,W,C) -> (N,Ho,Wo,k*k,C); used only for the tiny stride-2 stem conv1,
    the stem involution and the maxpool (all bf16)."""
    N, H, W, C = x.shape
    Ho = (H + 2 * pad - k) // stride + 1
    Wo = (W + 2 * pad - k) // stride + 1
    xp = jnp.pad(x, ((0, 0), (pad, pad), (pad, pad), (0, 0)), constant_values=pad_value)
    taps = []
    for i in range(k):
        for j in range(k):
            taps.append(xp[:, i:i + stride * Ho:stride, j:j + stride * Wo:stride, :])
    return jnp.stack(taps, axis=3), Ho, Wo


def fold_bn(bn, conv_bias, cout):
    if bn is None:
        scale = jnp.ones((cout,), jnp.float32)
        bias = conv_bias if conv_bias is not None else jnp.zeros((cout,), jnp.float32)
    else:
        scale = bn['gamma'] / jnp.sqrt(bn['var'] + _BN_EPS)
        bias = bn['beta'] - bn['mean'] * scale
        if conv_bias is not None:
            bias = bias + conv_bias * scale
    return scale, bias


def conv_bn_act(x, conv, bn, k, stride, pad, *, relu=False, residual=None):
    """Conv2d (PyTorch weight layout (Cout,Cin,kh,kw)) -> BN -> [+res] -> [ReLU]."""
    N, H, W, Cin = x.shape
    Cout = conv['w'].shape[0]
    if k == 3 and stride == 1 and pad == 1 and residual is None:
        return conv3x3_s1(x, conv, bn, relu=relu)          # direct conv, no im2col
    scale, bias = fold_bn(bn, conv['b'], Cout)
    if k == 1:
        xs = x[:, ::stride, ::stride, :] if stride > 1 else x
        Ho, Wo = xs.shape[1], xs.shape[2]
        x2d = xs.reshape(N * Ho * Wo, Cin)
        w2d = conv['w'].reshape(Cout, Cin).T
    else:
        # TODO(synk): strided 3x3 conv (stem conv1 only, Cin=3) still uses im2col.
        patches, Ho, Wo = extract_patches(x, k, stride, pad)
        x2d = patches.reshape(N * Ho * Wo, k * k * Cin)
        w2d = jnp.transpose(conv['w'], (2, 3, 1, 0)).reshape(k * k * Cin, Cout)
    w2d = w2d * scale[None, :]                              # fold BN scale into weights
    res2d = residual.reshape(N * Ho * Wo, Cout) if residual is not None else None
    out = gemm_bias_act(x2d, w2d, bias, relu=relu, residual=res2d)
    return out.reshape(N, Ho, Wo, Cout)


def involution_forward(x, p, *, relu_after=False):
    """Canonical RedNet Involution, kernel_size=3, stride=1."""
    N, H, W, C = x.shape
    gc = p['group_channels']
    groups = C // gc
    t = conv_bn_act(x, p['conv1'], p['bn1'], 1, 1, 0, relu=True)   # 1x1 -> BN -> ReLU
    w = conv_bn_act(t, p['conv2'], None, 1, 1, 0, relu=False)      # (N,H,W,9*groups)
    patches, _, _ = extract_patches(x, 3, 1, 1)                    # (N,H,W,9,C) bf16
    M = N * H * W
    w = jnp.transpose(w.reshape(M, groups, 9), (0, 2, 1))          # (M, 9, groups)
    out = involution_agg(patches.reshape(M, 9, C), w, gc, relu=relu_after)
    return out.reshape(N, H, W, C)


def stem_forward(x, p):
    # Sequential(conv 3x3 s2, BN, Involution, ReLU, conv 3x3 s1)
    x = conv_bn_act(x, p['conv1'], p['bn1'], 3, 2, 1, relu=False)
    x = involution_forward(x, p['inv'], relu_after=True)           # ReLU fused in kernel
    x = conv_bn_act(x, p['conv2'], None, 3, 1, 1, relu=False)      # direct 3x3 kernel
    return x


def maxpool_3x3_s2(x):
    N, H, W, C = x.shape
    # TODO(synk): replace the (M,9,C) patch materialization with a direct windowed
    # Pallas kernel; patches are bf16 here which already halves the traffic.
    patches, Ho, Wo = extract_patches(x, 3, 2, 1, pad_value=-jnp.inf)
    out = maxpool_reduce(patches.reshape(N * Ho * Wo, 9, C))
    return out.reshape(N, Ho, Wo, C)


def bottleneck_forward(x, p):
    stride = p['stride']
    out = conv_bn_act(x, p['conv1'], p['bn1'], 1, stride, 0, relu=True)
    # Reference forward has NO ReLU between bn2 and conv3 -> relu=False here.
    out = conv_bn_act(out, p['conv2'], p['bn2'], 3, 1, 1, relu=False)
    if p['downsample'] is not None:
        identity = conv_bn_act(x, p['downsample']['conv'], p['downsample']['bn'],
                               1, stride, 0, relu=False)
    else:
        identity = x
    # conv3 -> bn3 -> (+identity) -> ReLU, all fused in one Pallas GEMM kernel.
    out = conv_bn_act(out, p['conv3'], p['bn3'], 1, 1, 0, relu=True, residual=identity)
    # TODO(synk): nn.Dropout is stochastic in train mode; modeled as eval-mode identity.
    return out


def rednet_forward(params, x_nchw, out_indices=(1,)):
    x = jnp.transpose(x_nchw, (0, 2, 3, 1)).astype(jnp.bfloat16)    # NCHW -> NHWC bf16
    x = stem_forward(x, params['stem'])
    x = maxpool_3x3_s2(x)
    outs = []
    for i, blocks in enumerate(params['stages']):
        for blk in blocks:
            x = bottleneck_forward(x, blk)
        if i in out_indices:
            outs.append(jnp.transpose(x, (0, 3, 1, 2)).astype(jnp.float32))
    return outs[0] if len(outs) == 1 else tuple(outs)


# ----------------------------------------------------------------------------
# Deterministic parameter initialization (synthetic, not a checkpoint)
# ----------------------------------------------------------------------------

def init_conv(key, cin, cout, k, bias=True):
    kw, kb = jax.random.split(key)
    fan_in = cin * k * k
    w = jax.random.normal(kw, (cout, cin, k, k), jnp.float32) * (2.0 / fan_in) ** 0.5
    b = 0.01 * jax.random.normal(kb, (cout,), jnp.float32) if bias else None
    return {'w': w, 'b': b}


def init_bn(key, c):
    k1, k2, k3, k4 = jax.random.split(key, 4)
    return {'gamma': 1.0 + 0.1 * jax.random.normal(k1, (c,), jnp.float32),
            'beta': 0.1 * jax.random.normal(k2, (c,), jnp.float32),
            'mean': 0.1 * jax.random.normal(k3, (c,), jnp.float32),
            'var': 1.0 + 0.1 * jnp.abs(jax.random.normal(k4, (c,), jnp.float32))}


def init_involution(key, channels, kernel_size=3, group_channels=16, reduction=4):
    k1, k2, k3 = jax.random.split(key, 3)
    groups = channels // group_channels
    mid = channels // reduction
    return {'conv1': init_conv(k1, channels, mid, 1, bias=False),
            'bn1': init_bn(k2, mid),
            'conv2': init_conv(k3, mid, kernel_size * kernel_size * groups, 1, bias=True),
            'group_channels': group_channels}


ARCH_SETTINGS = {26: (1, 2, 4, 1), 38: (2, 3, 5, 2), 50: (3, 4, 6, 3),
                 101: (3, 4, 23, 3), 152: (3, 8, 36, 3)}


def init_rednet_params(key, depth=26, in_channels=3, stem_channels=32,
                       base_channels=32, num_stages=2, strides=(1, 2, 2, 2), expansion=4):
    stage_blocks = ARCH_SETTINGS[depth][:num_stages]
    keys = iter(jax.random.split(key, 512))
    nk = lambda: next(keys)
    sc2 = stem_channels // 2
    params = {'stem': {
        'conv1': init_conv(nk(), in_channels, sc2, 3, bias=True),
        'bn1': init_bn(nk(), sc2),
        'inv': init_involution(nk(), sc2),
        'conv2': init_conv(nk(), sc2, stem_channels, 3, bias=True),
    }}
    stages = []
    in_ch = stem_channels
    out_ch = base_channels * expansion
    for i, nb in enumerate(stage_blocks):
        stride = strides[i]
        blocks = []
        for b in range(nb):
            s = stride if b == 0 else 1
            cin = in_ch if b == 0 else out_ch
            mid = out_ch // expansion
            blk = {
                'conv1': init_conv(nk(), cin, mid, 1, bias=True),
                'bn1': init_bn(nk(), mid),
                'conv2': init_conv(nk(), mid, mid, 3, bias=True),
                'bn2': init_bn(nk(), mid),
                'conv3': init_conv(nk(), mid, out_ch, 1, bias=True),
                'bn3': init_bn(nk(), out_ch),
                'stride': s,
                'downsample': None,
            }
            if b == 0 and (stride != 1 or in_ch != out_ch):
                blk['downsample'] = {'conv': init_conv(nk(), cin, out_ch, 1, bias=False),
                                     'bn': init_bn(nk(), out_ch)}
            blocks.append(blk)
        stages.append(blocks)
        in_ch = out_ch
        out_ch *= 2
    params['stages'] = stages
    return params


# ----------------------------------------------------------------------------

if __name__ == "__main__":
    key = jax.random.PRNGKey(0)
    kx, kp = jax.random.split(key)

    # Small ReDSNet: depth=26, 2 stages, stem_channels=32, base_channels=32.
    x = jax.random.normal(kx, (2, 3, 16, 16), jnp.float32)          # NCHW like PyTorch
    params = init_rednet_params(kp, depth=26, in_channels=3, stem_channels=32,
                                base_channels=32, num_stages=2,
                                strides=(1, 2, 2, 2), expansion=4)

    out = rednet_forward(params, x, out_indices=(1,))
    out = jax.block_until_ready(out)

    # stem /2 -> maxpool /2 -> stage1 (s1) -> stage2 (s2): 16 -> 8 -> 4 -> 4 -> 2
    assert out.shape == (2, 256, 2, 2), out.shape
    assert bool(jnp.all(jnp.isfinite(out)))
    print("KERNEL_OK")
</pallas_src>

<mosaic_0001>
module attributes {stable_mosaic.version = 11 : i64} {
  func.func @kernel(%arg0: i32, %arg1: i32, %arg2: memref<64x128xbf16, #tpu.memory_space<vmem>>, %arg3: memref<128x128xbf16, #tpu.memory_space<vmem>>, %arg4: memref<1x128xf32, #tpu.memory_space<vmem>>, %arg5: memref<64x128xbf16, #tpu.memory_space<vmem>>) attributes {dimension_semantics = [#tpu.dimension_semantics<parallel>, #tpu.dimension_semantics<parallel>], iteration_bounds = array<i64: 2, 1>, scalar_prefetch = 0 : i64, scratch_operands = 0 : i64, tpu.core_type = #tpu.core_type<tc>, window_params = [{transform_indices = @transform_0, window_bounds = array<i64: 64, 128>}, {transform_indices = @transform_1, window_bounds = array<i64: 128, 128>}, {transform_indices = @transform_2, window_bounds = array<i64: 1, 128>}, {transform_indices = @transform_3, window_bounds = array<i64: 64, 128>}]} {
    %c0 = arith.constant 0 : index
    %c0_0 = arith.constant 0 : index
    %0 = vector.load %arg2[%c0, %c0_0] : memref<64x128xbf16, #tpu.memory_space<vmem>>, vector<64x128xbf16>
    %c0_1 = arith.constant 0 : index
    %c0_2 = arith.constant 0 : index
    %1 = vector.load %arg3[%c0_1, %c0_2] : memref<128x128xbf16, #tpu.memory_space<vmem>>, vector<128x128xbf16>
    %cst = arith.constant dense<0.000000e+00> : vector<64x128xf32>
    %2 = tpu.matmul %0, %1, %cst {dimension_numbers = #tpu.dot_dimension_numbers<[1], [0], [0], [1], [0, 0, 1, 1], [], []>} : vector<64x128xbf16>, vector<128x128xbf16>, vector<64x128xf32> -> vector<64x128xf32>
    %c0_3 = arith.constant 0 : index
    %c0_4 = arith.constant 0 : index
    %3 = vector.load %arg4[%c0_3, %c0_4] : memref<1x128xf32, #tpu.memory_space<vmem>>, vector<1x128xf32>
    %4 = vector.broadcast %3 : vector<1x128xf32> to vector<64x128xf32>
    %5 = arith.addf %2, %4 : vector<64x128xf32>
    %6 = arith.truncf %5 : vector<64x128xf32> to vector<64x128xbf16>
    %c0_5 = arith.constant 0 : index
    %c0_6 = arith.constant 0 : index
    %7 = vector.load %arg5[%c0_5, %c0_6] : memref<64x128xbf16, #tpu.memory_space<vmem>>, vector<64x128xbf16>
    tpu.vector_store %arg5[%c0_5, %c0_6], %6 {strides = array<i32>} : memref<64x128xbf16, #tpu.memory_space<vmem>>, vector<64x128xbf16>,
    return
  }
  func.func @transform_0(%arg0: i32, %arg1: i32) -> (i32, i32) {
    %c0_i32 = arith.constant 0 : i32
    %c0_i32_0 = arith.constant 0 : i32
    return %arg0, %c0_i32 : i32, i32
  }
  func.func @transform_1(%arg0: i32, %arg1: i32) -> (i32, i32) {
    %c0_i32 = arith.constant 0 : i32
    %c0_i32_0 = arith.constant 0 : i32
    return %c0_i32, %arg1 : i32, i32
  }
  func.func @transform_2(%arg0: i32, %arg1: i32) -> (i32, i32) {
    %c0_i32 = arith.constant 0 : i32
    %c0_i32_0 = arith.constant 0 : i32
    return %c0_i32, %arg1 : i32, i32
  }
  func.func @transform_3(%arg0: i32, %arg1: i32) -> (i32, i32) {
    %c0_i32 = arith.constant 0 : i32
    return %arg0, %arg1 : i32, i32
  }
}

</mosaic_0001>

<bundles_post_ra>
// kernel: tpu_custom_call.1
= control target key start
LH: loop header
LB: loop body
LE: loop exit
PB: predicated region body
PF: predicated region fallthrough
CT: control target
= control target key end

     0   :  { %8 = vsyncpa [#allocation3], 0  ;;  %s1196_s0 = inlined_call_operand.hbm [shape: bf16[128,128], index: 0, kind: input, shape index: {}]   ;;  %s1197_s1 = inlined_call_operand.hbm [shape: bf16[128,128], index: 1, kind: input, shape index: {}]   ;;  %s1198_s2 = inlined_call_operand.vmem [shape: f32[1,128], index: 2, kind: input, shape index: {}]   ;;  %s1199_s3 = inlined_call_operand.hbm [shape: bf16[128,128], index: 3, kind: output, shape index: {}]  }
   0x1   :  { %10 = vsyncpa [#allocation3 + $0x1], 0 }
   0x2   :  { %11 = vsyncpa [#allocation6], 0 }
   0x3   :  { %12 = vsyncpa [#allocation4], 0 }
   0x4   :  { %14 = vsyncpa [#allocation4 + $0x1], 0  ;;  %s958_s12 = smov 0   ;;  %s960_s13 = smov 0  }
   0x5   :  { %s962_s14 = smov 0   ;;  %s964_s15 = smov 0  }
   0x6   :  { %s966_s16 = smov 0   ;;  %s968_s17 = smov 0  }
   0x7 LB: > { %s572_s18 = sadd.s32 4294967295, %s929_s17   ;;  %s573_s19 = sadd.s32 4294967294, %s929_s17   ;;  %s929_s17 = sphi %s968_s17, %s20_s17   ;;  %s925_s16 = sphi %s966_s16, %s1223_s16   ;;  %s921_s15 = sphi %s964_s15, %s1222_s15   ;;  %s917_s14 = sphi %s962_s14, %s1221_s14   ;;  %s913_s13 = sphi %s960_s13, %s1220_s13   ;;  %s909_s12 = sphi %s958_s12, %s1219_s12  }
   0x8   : > { %p52_p0 = scmp.ne.s32.totalorder %s913_s13, %s909_s12  ;;  %p992_p1 = scmp.eq.s32.totalorder %s572_s18, 0 }
   0x9   : > { %p996_p2 = scmp.eq.s32.totalorder %s572_s18, 1  ;;  %p136_p3 = scmp.eq.s32.totalorder %s573_s19, 1 }
   0xa   : > { %s1204_s20 = scalar_select %p992_p1, 1, 0 }
   0xb   : > { %s1205_s21 = scalar_select %p996_p2, 1, 0 }
   0xc   : > { %p1002_p4 = por %p992_p1, %p52_p0  ;;  %p574_p5 = scmp.ge.s32.totalorder %s929_s17, 1 }
   0xd   : > { %p1007_p6 = por %p136_p3, %p52_p0  ;;  %p143_p7 = scmp.lt.s32.totalorder %s929_s17, 3 }
   0xe   : > { %s1206_s22 = scalar_select %p1002_p4, 1, 0 }
   0xf   : > { %s1207_s23 = scalar_select %p1007_p6, 1, 0 }
  0x10   : > { %p1012_p8 = pnand %p574_p5, %p143_p7  ;;  %s931_s25 = smov [#allocation5]  }
  0x11   : > { %s157_s26 = sshll.u32 %s931_s25, 4  ;;  %s32_s28 = sadd.s32 1, %s925_s16  ;;  %s158_s26 = int_to_ptr.vmem [resolvable:$true] %s157_s26 }
  0x12   : > { %s1208_s24 = scalar_select %p1012_p8, 1, 0 }
  0x13   : > { %p704_p9 = pneg %p1012_p8  ;;  %s785_s4 = scalar_lea.hbm %s1197_s1, 1024 }
  0x14   : > { %p786_p12 = scmp.ne.s32.totalorder %s1197_s1, %s785_s4  ;;  %p792_p5 = scmp.lt.u32.totalorder %s785_s4, %s1197_s1 }
  0x15   : > { %p1021_p11 = pnand %p704_p9, %p992_p1 }
  0x17   : > { %p787_p13 = pneg %p1021_p11 }
  0x19   : > { %p788_p0 = pnand %p787_p13, %p786_p12 }
  0x1b   : > { %p789_p3 = pneg %p788_p0 }
  0x1d   : > { %p794_p7 = pnand %p792_p5, %p789_p3 }
  0x1f   : > { %797 = shalt.err (!%p794_p7)
}
  0x20   : > { %s798_s9 = scalar_lea.vmem %s158_s26, 1024  ;;  %p806_p1 = scmp.lt.s32.totalorder %s158_s26, %s158_s26 }
  0x21   : > { %p799_p9 = scmp.ne.s32.totalorder %s158_s26, %s798_s9  ;;  %p807_p4 = scmp.lt.s32.totalorder %s798_s9, %s798_s9 }
  0x23   : > { %p801_p10 = pnand %p799_p9, %p787_p13  ;;  %p808_p8 = por %p807_p4, %p806_p1 }
  0x25   : > { %p802_p6 = pneg %p801_p10 }
  0x27   : > { %p809_p2 = pnand %p808_p8, %p802_p6 }
  0x29   : > { %812 = shalt.err (!%p809_p2)
}
  0x2a   : > { %s932_s10 = smov 64   ;;  %s933_s11 = smov 4  }
  0x2b   : > { %707 = dma.hbm_to_vmem [thread:$0]  (!%p1021_p11), %s1197_s1, 1024, %s158_s26, [#allocation6], %s932_s10, %s932_s10, %s933_s11  }
  0x2c   : > { %p34_p1 = scmp.ge.s32.totalorder %s32_s28, 2  ;;  %s39_s25 = sadd.s32 1, %s917_s14 }
  0x2d   : > { %p46_p2 = scmp.ne.s32.totalorder %s917_s14, %s913_s13  ;;  %p47_p4 = scmp.eq.s32.totalorder %s929_s17, 0 }
  0x2e   : > { %s1225_s28 = smov (%p34_p1, %s32_s28), 0  ;;  %p1211_p8 = scmp.ne.s32.totalorder %s1205_s21, 0 }
  0x2f   : > { %p1051_p6 = por %p47_p4, %p46_p2  ;;  %s36_s30 = ssub.s32 %s925_s16, %s1225_s28 }
  0x30   : > { %p1057_p10 = por %p1211_p8, %p46_p2  ;;  %p717_p12 = scmp.lt.s32.totalorder %s929_s17, 2 }
  0x31   : > { %p37_p11 = scmp.eq.s32.totalorder %s36_s30, 0  ;;  %s177_s26 = sand.u32 1, %s917_s14  }
  0x32   : > { %s578_s4 = sshll.u32 %s177_s26, 5  ;;  %s611_s6 = sshll.u32 %s925_s16, 9 }
  0x33   : > { %s1066_s5 = scalar_select %p37_p11, %s917_s14, %s39_s25  }
  0x34   : > { %s1072_s9 = scalar_lea.hbm %s1196_s0, %s611_s6  ;;  %s181_s21 = scalar_lea.vmem [#allocation2], %s578_s4 }
  0x35   : > { %s188_s18 = sshll.u32 %s181_s21, 4  ;;  %p1078_p13 = pnand %p717_p12, %p1051_p6  ;;  %s1074_s18 = int_to_ptr.vmem [resolvable:$true] %s188_s18 }
  0x36   : > { %s1082_s25 = scalar_lea.sflag [#allocation3], %s177_s26  ;;  %s813_s30 = scalar_lea.hbm %s1072_s9, 512 }
  0x37   : > { %p814_p0 = scmp.ne.s32.totalorder %s1072_s9, %s813_s30  ;;  %p815_p3 = pneg %p1078_p13 }
  0x38   : > { %s818_s29 = scalar_lea.hbm %s1196_s0, 1024  ;;  %p819_p9 = scmp.lt.u32.totalorder %s1072_s9, %s1196_s0 }
  0x39   : > { %p816_p5 = pnand %p815_p3, %p814_p0  ;;  %p820_p1 = scmp.lt.u32.totalorder %s818_s29, %s813_s30 }
  0x3a   : > { %p822_p4 = scmp.lt.u32.totalorder %s813_s30, %s1072_s9 }
  0x3b   : > { %p817_p7 = pneg %p816_p5  ;;  %p821_p2 = por %p820_p1, %p819_p9 }
  0x3d   : > { %p823_p6 = por %p822_p4, %p821_p2 }
  0x3f   : > { %p824_p8 = pnand %p823_p6, %p817_p7 }
  0x41   : > { %827 = shalt.err (!%p824_p8)
}
  0x42   : > { %s828_s26 = scalar_lea.vmem %s1074_s18, 512  ;;  %s934_s21 = smov [#allocation2]  }
  0x43   : > { %p829_p12 = scmp.ne.s32.totalorder %s1074_s18, %s828_s26  ;;  %s833_s4 = sshll.u32 %s934_s21, 4  ;;  %s834_s4 = int_to_ptr.vmem [resolvable:$false] %s833_s4 }
  0x44   : > { %s835_s6 = scalar_lea.vmem %s834_s4, 1024  ;;  %p836_p5 = scmp.lt.s32.totalorder %s1074_s18, %s834_s4 }
  0x45   : > { %p831_p11 = pnand %p829_p12, %p815_p3  ;;  %p837_p9 = scmp.lt.s32.totalorder %s835_s6, %s828_s26 }
  0x47   : > { %p832_p0 = pneg %p831_p11  ;;  %p838_p1 = por %p837_p9, %p836_p5 }
  0x49   : > { %p839_p2 = pnand %p838_p1, %p832_p0 }
  0x4b   : > { %842 = shalt.err (!%p839_p2)
}
  0x4c   : > { %711 = dma.hbm_to_vmem [thread:$0]  (!%p1078_p13), %s1072_s9, 512, %s1074_s18, %s1082_s25, %s932_s10, %s932_s10, %s933_s11  }
  0x4d   : > { %p1214_p3 = scmp.ne.s32.totalorder %s1208_s24, 0 }
  0x4e   : > { %s1116_s30 = sand.u32 (!%p1214_p3), 1, %s913_s13   ;;  %p1215_p7 = scmp.ne.s32.totalorder (!%p1214_p3), %s1206_s22, 0 }
  0x4f   : > { %200 = sbr.rel (%p1214_p3) target bundleno = 357 (0x165), region = 32  ;;  %s582_s29 = sshll.u32 (!%p1214_p3), %s1116_s30, 5 }
  0x50   : > { %s203_s7 = scalar_lea.sflag (!%p1214_p3), [#allocation3], %s1116_s30  ;;  %s1122_s19 = scalar_lea.vmem (!%p1214_p3), [#allocation2], %s582_s29 }
  0x56   : > { %896 = dma.done.wait (%p1215_p7), %s203_s7, 512  }
  0x57   : > { %898 = vsyncadd (%p1215_p7), %s203_s7, 4294966784  ;;  %p1216_p13 = scmp.ne.s32.totalorder %s1204_s20, 0 }
  0x59   : > { %900 = dma.done.wait (%p1216_p13), [#allocation6], 1024  }
  0x5a   : > { %902 = vsyncadd (%p1216_p13), [#allocation6], 4294966272  ;;  %v773_v0 = vld [vmem:[#allocation5] sm:$0xff]   ;;  %v774_v1 = vld [vmem:[#allocation5 + $0x8] sm:$0xff]   ;;  %s235_s24 = scalar_lea.vmem [#allocation7], %s582_s29  ;;  %s620_s11 = sshll.u32 %s921_s15, 9 }
  0x5b   : > { %656 = vmatprep.subr.bf16.mxu0 %v773_v0  ;;  %680 = vmatprep.subr.bf16.mxu1 %v773_v0  ;;  %v775_v2 = vld [vmem:[#allocation5 + $0x10] sm:$0xff]   ;;  %v776_v3 = vld [vmem:[#allocation5 + $0x18] sm:$0xff]   ;;  %v781_v4 = vld [vmem:[%s1122_s19] sm:$0xff]   ;;  %s465_s10 = sshll.u32 %s235_s24, 4  ;;  %s1147_s18 = scalar_lea.hbm %s1199_s3, %s620_s11  ;;  %s1142_s10 = int_to_ptr.vmem [resolvable:$true] %s465_s10 }
  0x5c   : > { %657 = vmatpush3.bf16.msra.mxu0 %v773_v0  ;;  %688 = vmatpush3.bf16.msra.mxu1 %v773_v0  ;;  %v782_v5 = vld [vmem:[%s1122_s19 + $0x10] sm:$0xff]   ;;  %v777_v6 = vld [vmem:[#allocation5 + $0x20] sm:$0xff]   ;;  %v778_v7 = vld [vmem:[#allocation5 + $0x28] sm:$0xff]   ;;  %s451_s25 = scalar_lea.sflag [#allocation4], %s1116_s30  ;;  %s843_s8 = scalar_lea.vmem %s1142_s10, 512 }
  0x5d   : > { %658 = vmatprep.subr.bf16.mxu0 %v774_v1  ;;  %681 = vmatprep.subr.bf16.mxu1 %v774_v1  ;;  %v779_v8 = vld [vmem:[#allocation5 + $0x30] sm:$0xff]   ;;  %v780_v9 = vld [vmem:[#allocation5 + $0x38] sm:$0xff]   ;;  %v783_v10 = vld [vmem:[%s1122_s19 + $0x8] sm:$0xff]   ;;  %p844_p4 = scmp.ne.s32.totalorder %s1142_s10, %s843_s8  ;;  %s935_s26 = smov [#allocation7]  }
  0x5e   : > { %672 = vmatprep.mubr.bf16.mxu0 %v781_v4  ;;  %676 = vmatprep.mubr.bf16.mxu1 %v782_v5  ;;  %v784_v11 = vld [vmem:[%s1122_s19 + $0x18] sm:$0xff]   ;;  %v585_v13 = vld [vmem:[%s1198_s2] ss:$0 sm:$0xff]  ;;  %s847_s21 = sshll.u32 %s935_s26, 4  ;;  %s848_s21 = int_to_ptr.vmem [resolvable:$false] %s847_s21 }
  0x5f   : > { %p845_p6 = pnand %p844_p4, %p1057_p10  ;;  %s849_s4 = scalar_lea.vmem %s848_s21, 1024 }
  0x60   : > { %659 = vmatpush3.bf16.msra.mxu0 %v774_v1  ;;  %689 = vmatpush3.bf16.msra.mxu1 %v774_v1  ;;  %p850_p12 = scmp.lt.s32.totalorder %s1142_s10, %s848_s21  ;;  %p851_p11 = scmp.lt.s32.totalorder %s849_s4, %s843_s8 }
  0x61   : > { %660 = vmatprep.subr.bf16.mxu0 %v775_v2  ;;  %682 = vmatprep.subr.bf16.mxu1 %v775_v2  ;;  %p846_p8 = pneg %p845_p6 }
  0x62   : > { %p852_p0 = por %p851_p11, %p850_p12 }
  0x64   : > { %661 = vmatpush3.bf16.msra.mxu0 %v775_v2  ;;  %690 = vmatpush3.bf16.msra.mxu1 %v775_v2  ;;  %p853_p5 = pnand %p852_p0, %p846_p8 }
  0x65   : > { %662 = vmatprep.subr.bf16.mxu0 %v776_v3  ;;  %683 = vmatprep.subr.bf16.mxu1 %v776_v3 }
  0x68   : > { %663 = vmatpush3.bf16.msra.mxu0 %v776_v3  ;;  %691 = vmatpush3.bf16.msra.mxu1 %v776_v3 }
  0x69   : > { %664 = vmatprep.subr.bf16.mxu0 %v777_v6  ;;  %684 = vmatprep.subr.bf16.mxu1 %v777_v6 }
  0x6c   : > { %665 = vmatpush3.bf16.msra.mxu0 %v777_v6  ;;  %692 = vmatpush3.bf16.msra.mxu1 %v777_v6 }
  0x6d   : > { %666 = vmatprep.subr.bf16.mxu0 %v778_v7  ;;  %685 = vmatprep.subr.bf16.mxu1 %v778_v7 }
  0x70   : > { %667 = vmatpush3.bf16.msra.mxu0 %v778_v7  ;;  %693 = vmatpush3.bf16.msra.mxu1 %v778_v7 }
  0x71   : > { %668 = vmatprep.subr.bf16.mxu0 %v779_v8  ;;  %686 = vmatprep.subr.bf16.mxu1 %v779_v8 }
  0x74   : > { %669 = vmatpush3.bf16.msra.mxu0 %v779_v8  ;;  %694 = vmatpush3.bf16.msra.mxu1 %v779_v8 }
  0x75   : > { %670 = vmatprep.subr.bf16.mxu0 %v780_v9  ;;  %687 = vmatprep.subr.bf16.mxu1 %v780_v9 }
  0x78   : > { %671 = vmatpush3.bf16.msra.mxu0 %v780_v9  ;;  %695 = vmatpush3.bf16.msra.mxu1 %v780_v9 }
  0x7b   : > { %673 = vmatmul.mubr.bf16.vlgmr.msra.gmra.mrb[0].mxu0 %v783_v10  ;;  %677 = vmatmul.mubr.bf16.vlgmr.msra.gmra.mrb[0].mxu1 %v784_v11 }
 0x14e   : > { %v674_v12 = vpop.f32.mrb[0].mxu0  ;;  %v678_v14 = vpop.f32.mrb[0].mxu1 }
 0x14f   : > { %v379_v15 = vpop.f32.mrb[1].mxu0  ;;  %v395_v16 = vpop.f32.mrb[1].mxu1  ;;  %v388_v19 = vadd.f32 %v674_v12, %v585_v13  ;;  %v404_v20 = vadd.f32 %v678_v14, %v585_v13 }
 0x150   : > { %v675_v17 = vpop.f32.mrb[2].mxu0  ;;  %v679_v18 = vpop.f32.mrb[2].mxu1  ;;  %v380_v25 = vadd.f32 %v585_v13, %v379_v15  ;;  %v396_v26 = vadd.f32 %v585_v13, %v395_v16 }
 0x151   : > { %v391_v21 = vadd.f32 %v675_v17, %v585_v13  ;;  %v407_v22 = vadd.f32 %v679_v18, %v585_v13  ;;  %v382_v23 = vpop.f32.mrb[3].mxu0  ;;  %v398_v24 = vpop.f32.mrb[3].mxu1 }
 0x152   : > { %v383_v27 = vadd.f32 %v585_v13, %v382_v23  ;;  %v399_v28 = vadd.f32 %v585_v13, %v398_v24 }
 0x153   : > { %v629_v29 = vpack.c.bf16 %v391_v21, %v388_v19  ;;  %v639_v30 = vpack.c.bf16 %v407_v22, %v404_v20 }
 0x154   : > { %v624_v31 = vpack.c.bf16 %v383_v27, %v380_v25  ;;  %v634_v32 = vpack.c.bf16 %v399_v28, %v396_v26 }
 0x155   : > { %641 = vst [vmem:[%s235_s24 + $0x8] sm:$0xff] %v629_v29   ;;  %643 = vst [vmem:[%s235_s24 + $0x18] sm:$0xff] %v639_v30  }
 0x156   : > { %625 = vst [vmem:[%s235_s24] sm:$0xff] %v624_v31   ;;  %642 = vst [vmem:[%s235_s24 + $0x10] sm:$0xff] %v634_v32  }
 0x157   : > { %856 = shalt.err (!%p853_p5)
}
 0x158   : > { %s857_s6 = scalar_lea.hbm %s1147_s18, 512  ;;  %s861_s19 = scalar_lea.hbm %s1199_s3, 1024 }
 0x159   : > { %p858_p9 = scmp.ne.s32.totalorder %s1147_s18, %s857_s6  ;;  %p862_p3 = scmp.lt.u32.totalorder %s1147_s18, %s1199_s3 }
 0x15a   : > { %p863_p7 = scmp.lt.u32.totalorder %s861_s19, %s857_s6  ;;  %p865_p4 = scmp.lt.u32.totalorder %s857_s6, %s1147_s18 }
 0x15b   : > { %p859_p1 = pnand %p858_p9, %p1057_p10 }
 0x15c   : > { %p864_p13 = por %p863_p7, %p862_p3 }
 0x15d   : > { %p860_p2 = pneg %p859_p1 }
 0x15e   : > { %p866_p6 = por %p865_p4, %p864_p13 }
 0x160   : > { %p867_p8 = pnand %p866_p6, %p860_p2 }
 0x162   : > { %870 = shalt.err (!%p867_p8)
}
 0x163   : > { %s936_s24 = smov 64   ;;  %s937_s11 = smov 4  }
 0x164   : > { %702 = dma.vmem_to_hbm [thread:$0]  (%p1057_p10), %s1142_s10, 512, %s1147_s18, %s451_s25, %s936_s24, %s936_s24, %s937_s11  }
 0x165 PF: > { %s480_s9 = sand.u32 1, %s909_s12   ;;  %p1217_p12 = scmp.ne.s32.totalorder %s1207_s23, 0 }
 0x166   : > { %p1218_p11 = scmp.ge.s32.totalorder %s929_s17, 2  ;;  %s481_s15 = scalar_lea.sflag [#allocation4], %s480_s9 }
 0x168   : > { %p713_p0 = pnand %p1218_p11, %p1217_p12 }
 0x16a   : > { %904 = dma.done.wait (!%p713_p0), %s481_s15, 512  }
 0x16b   : > { %906 = vsyncadd (!%p713_p0), %s481_s15, 4294966784  ;;  %s20_s17 = sadd.s32 1, %s929_s17   ;;  %s1219_s12 = smov %s913_s13 }
 0x16c   : > { %p17_p5 = scmp.ge.s32.totalorder %s20_s17, 4   ;;  %s1220_s13 = smov %s917_s14 }
 0x16d   : > { %s1221_s14 = smov %s1066_s5  ;;  %s1222_s15 = smov %s925_s16 }
 0x16e   : > { %s1223_s16 = smov %s1225_s28  ;;  %19 = sbr.rel (!%p17_p5) target bundleno = 7 (0x7), region = 85 }
 0x175   :  { %486 = vsyncpa [#allocation3], 1 }
 0x176   :  { %488 = vsyncpa [#allocation3 + $0x1], 1 }
 0x177   :  { %489 = vsyncpa [#allocation6], 1 }
 0x178   :  { %490 = vsyncpa [#allocation4], 1 }
 0x179   :  { %492 = vsyncpa [#allocation4 + $0x1], 1 }

</bundles_post_ra>
